<compile_context>
chip_gen: v7x
topology: tpu7x:2x2x1
jax: 0.10.0
libtpu: 0.0.40
codegen_flags: <defaults>
</compile_context>

<pallas_src>
import jax
import jax.numpy as jnp
from jax.experimental import pallas as pl
from jax.experimental.pallas import tpu as pltpu

_LANE = 128  # lane width of a vreg / MXU minor dim


def _round_up(x, m):
    return ((x + m - 1) // m) * m


def _pad2(a, shape):
    """Zero-pad a 2-D array up to `shape` (no-op if already that shape)."""
    pads = [(0, t - s) for s, t in zip(a.shape, shape)]
    if all(p == (0, 0) for p in pads):
        return a
    return jnp.pad(a, pads)


def _pick_block_b(B, d_in_p, h_p, d_out_p, compute_bytes,
                  vmem_budget_bytes=20 * 1024 * 1024):
    """Pick a batch tile: multiple of 8, VMEM-safe, >=2 grid steps at large B."""
    b_pad = _round_up(B, 8)
    # For larger batches split into at least 2 grid steps so both v7x TensorCores
    # get work and the pipeline has something to overlap.
    max_tile = _round_up(pl.cdiv(b_pad, 2), 8) if b_pad >= 512 else b_pad
    # Weights/biases are single-buffered residents (pl.Buffered(1)).
    weight_bytes = ((d_in_p * h_p + h_p * d_out_p) * compute_bytes
                    + (h_p + d_out_p) * 4)
    tile = _round_up(min(max_tile, 512), 8)  # 512-row tiles ~85% of HBM roofline
    while tile > 8:
        act_bytes = (2 * tile * d_in_p * compute_bytes   # x tile, double-buffered
                     + 2 * tile * d_out_p * 4            # out tile, double-buffered
                     + tile * h_p * 4)                   # fc1 activation in flight
        if weight_bytes + act_bytes <= vmem_budget_bytes:
            break
        tile = max(8, _round_up(tile // 2, 8))
    return max(tile, 8)


def _mlp_kernel(x_ref, w1_ref, b1_ref, w2_ref, b2_ref, o_ref):
    # fc1: (tb, Din_p) @ (Din_p, H_p) on the MXU with f32 accumulation.
    h = jnp.dot(x_ref[...], w1_ref[...], preferred_element_type=jnp.float32)
    h = jnp.maximum(h + b1_ref[...], 0.0)
    # fc2: cast the activation back to the compute dtype so the MXU runs bf16.
    y = jnp.dot(h.astype(w2_ref.dtype), w2_ref[...],
                preferred_element_type=jnp.float32)
    y = jnp.maximum(y + b2_ref[...], 0.0)
    o_ref[...] = y.astype(o_ref.dtype)


def attribute_network_forward(x, w1t, b1, w2t, b2, *, block_b=None,
                              compute_dtype=jnp.bfloat16):
    """x: (B, D_in); w1t: (D_in, H); b1: (H,); w2t: (H, D_out); b2: (D_out,).

    Weights are stored pre-transposed (in, out) so the kernel computes x @ W + b.
    Returns (B, D_out) float32.
    """
    B, d_in = x.shape
    hidden = w1t.shape[1]
    d_out = w2t.shape[1]

    # Pad tiny feature dims to full 128-lane multiples (zero padding is exact:
    # padded K columns contribute 0 to the f32 accumulation, padded output
    # columns are sliced off below).
    d_in_p = _round_up(d_in, _LANE)
    h_p = _round_up(hidden, _LANE)
    d_out_p = _round_up(d_out, _LANE)

    cd = jnp.dtype(compute_dtype)
    cb = cd.itemsize
    x_p = _pad2(x, (B, d_in_p)).astype(cd)
    w1_p = _pad2(w1t, (d_in_p, h_p)).astype(cd)
    w2_p = _pad2(w2t, (h_p, d_out_p)).astype(cd)
    b1_p = _pad2(b1.reshape(1, -1), (1, h_p)).astype(jnp.float32)
    b2_p = _pad2(b2.reshape(1, -1), (1, d_out_p)).astype(jnp.float32)

    if block_b is None:
        block_b = _pick_block_b(B, d_in_p, h_p, d_out_p, cb)
    block_b = max(8, _round_up(min(block_b, _round_up(B, 8)), 8))
    grid = (pl.cdiv(B, block_b),)

    # Advisory cost so XLA schedules this custom call sensibly in larger graphs.
    flops = 2 * B * (d_in_p * h_p + h_p * d_out_p)
    bytes_accessed = (B * d_in_p * cb
                      + (d_in_p * h_p + h_p * d_out_p) * cb
                      + (h_p + d_out_p) * 4
                      + B * d_out_p * 4)

    # Grid-invariant operands: single buffer, fetched once, no 2x VMEM footprint.
    resident = pl.Buffered(buffer_count=1)

    out_p = pl.pallas_call(
        _mlp_kernel,
        out_shape=jax.ShapeDtypeStruct((B, d_out_p), jnp.float32),
        grid=grid,
        in_specs=[
            pl.BlockSpec((block_b, d_in_p), lambda i: (i, 0)),        # x batch tile
            pl.BlockSpec((d_in_p, h_p), lambda i: (0, 0),
                         pipeline_mode=resident),                     # w1^T
            pl.BlockSpec((1, h_p), lambda i: (0, 0),
                         pipeline_mode=resident),                     # b1
            pl.BlockSpec((h_p, d_out_p), lambda i: (0, 0),
                         pipeline_mode=resident),                     # w2^T
            pl.BlockSpec((1, d_out_p), lambda i: (0, 0),
                         pipeline_mode=resident),                     # b2
        ],
        out_specs=pl.BlockSpec((block_b, d_out_p), lambda i: (i, 0)),  # lane-dense
        compiler_params=pltpu.CompilerParams(
            dimension_semantics=("parallel",),
            vmem_limit_bytes=32 * 1024 * 1024,   # explicit; safe on v5e/v6e/v7x
        ),
        cost_estimate=pl.CostEstimate(
            flops=flops, transcendentals=0, bytes_accessed=bytes_accessed),
    )(x_p, w1_p, b1_p, w2_p, b2_p)

    # Slice the lane padding back off.
    return out_p[:, :d_out]


def init_params(key, input_size, hidden_size, output_size):
    """Deterministic init mimicking nn.Linear default: U(-1/sqrt(fan_in), +)."""
    k1, k2, k3, k4 = jax.random.split(key, 4)
    bound1 = 1.0 / jnp.sqrt(input_size)
    bound2 = 1.0 / jnp.sqrt(hidden_size)
    # Stored as (in, out) == transpose of PyTorch's (out, in) weight.
    w1t = jax.random.uniform(k1, (input_size, hidden_size), jnp.float32, -bound1, bound1)
    b1 = jax.random.uniform(k2, (hidden_size,), jnp.float32, -bound1, bound1)
    w2t = jax.random.uniform(k3, (hidden_size, output_size), jnp.float32, -bound2, bound2)
    b2 = jax.random.uniform(k4, (output_size,), jnp.float32, -bound2, bound2)
    return w1t, b1, w2t, b2


def _reference(x, w1t, b1, w2t, b2, compute_dtype=jnp.bfloat16):
    """Pure-JAX reference following the same precision path as the kernel."""
    cd = jnp.dtype(compute_dtype)
    h = jnp.dot(x.astype(cd), w1t.astype(cd), preferred_element_type=jnp.float32)
    h = jnp.maximum(h + b1.astype(jnp.float32), 0.0)
    y = jnp.dot(h.astype(cd), w2t.astype(cd), preferred_element_type=jnp.float32)
    y = jnp.maximum(y + b2.astype(jnp.float32), 0.0)
    return y


if __name__ == "__main__":
    # Small shapes consistent with the module's forward: x is (batch, input_size).
    B, INPUT, HIDDEN, OUTPUT = 8, 32, 64, 16

    key = jax.random.PRNGKey(0)
    kx, kp = jax.random.split(key)
    x = jax.random.normal(kx, (B, INPUT), jnp.float32)
    w1t, b1, w2t, b2 = init_params(kp, INPUT, HIDDEN, OUTPUT)

    out = attribute_network_forward(x, w1t, b1, w2t, b2)
    out = jax.block_until_ready(out)

    # Reference check (same bf16-in / f32-accumulate path as the kernel).
    ref = _reference(x, w1t, b1, w2t, b2)
    assert out.shape == (B, OUTPUT)
    assert jnp.allclose(out, ref, atol=1e-3, rtol=1e-3), (
        float(jnp.max(jnp.abs(out - ref))))

    print("KERNEL_OK")
</pallas_src>

<mosaic_0001>
module attributes {stable_mosaic.version = 11 : i64} {
  func.func @_mlp_kernel(%arg0: i32, %arg1: memref<8x128xbf16, #tpu.memory_space<vmem>>, %arg2: memref<128x128xbf16, #tpu.memory_space<vmem>>, %arg3: memref<1x128xf32, #tpu.memory_space<vmem>>, %arg4: memref<128x128xbf16, #tpu.memory_space<vmem>>, %arg5: memref<1x128xf32, #tpu.memory_space<vmem>>, %arg6: memref<8x128xf32, #tpu.memory_space<vmem>>) attributes {dimension_semantics = [#tpu.dimension_semantics<parallel>], iteration_bounds = array<i64: 1>, scalar_prefetch = 0 : i64, scratch_operands = 0 : i64, tpu.core_type = #tpu.core_type<tc>, window_params = [{transform_indices = @transform_0, window_bounds = array<i64: 8, 128>}, {pipeline_mode = #tpu.pipeline_mode<synchronous>, transform_indices = @transform_1, window_bounds = array<i64: 128, 128>}, {pipeline_mode = #tpu.pipeline_mode<synchronous>, transform_indices = @transform_2, window_bounds = array<i64: 1, 128>}, {pipeline_mode = #tpu.pipeline_mode<synchronous>, transform_indices = @transform_3, window_bounds = array<i64: 128, 128>}, {pipeline_mode = #tpu.pipeline_mode<synchronous>, transform_indices = @transform_4, window_bounds = array<i64: 1, 128>}, {transform_indices = @transform_5, window_bounds = array<i64: 8, 128>}]} {
    %c0 = arith.constant 0 : index
    %c0_0 = arith.constant 0 : index
    %0 = vector.load %arg1[%c0, %c0_0] : memref<8x128xbf16, #tpu.memory_space<vmem>>, vector<8x128xbf16>
    %c0_1 = arith.constant 0 : index
    %c0_2 = arith.constant 0 : index
    %1 = vector.load %arg2[%c0_1, %c0_2] : memref<128x128xbf16, #tpu.memory_space<vmem>>, vector<128x128xbf16>
    %cst = arith.constant dense<0.000000e+00> : vector<8x128xf32>
    %2 = tpu.matmul %0, %1, %cst {dimension_numbers = #tpu.dot_dimension_numbers<[1], [0], [0], [1], [0, 0, 1, 1], [], []>} : vector<8x128xbf16>, vector<128x128xbf16>, vector<8x128xf32> -> vector<8x128xf32>
    %c0_3 = arith.constant 0 : index
    %c0_4 = arith.constant 0 : index
    %3 = vector.load %arg3[%c0_3, %c0_4] : memref<1x128xf32, #tpu.memory_space<vmem>>, vector<1x128xf32>
    %4 = vector.broadcast %3 : vector<1x128xf32> to vector<8x128xf32>
    %5 = arith.addf %2, %4 : vector<8x128xf32>
    %cst_5 = arith.constant 0.000000e+00 : f32
    %6 = vector.broadcast %cst_5 : f32 to vector<8x128xf32>
    %7 = arith.maximumf %5, %6 : vector<8x128xf32>
    %8 = arith.truncf %7 : vector<8x128xf32> to vector<8x128xbf16>
    %c0_6 = arith.constant 0 : index
    %c0_7 = arith.constant 0 : index
    %9 = vector.load %arg4[%c0_6, %c0_7] : memref<128x128xbf16, #tpu.memory_space<vmem>>, vector<128x128xbf16>
    %cst_8 = arith.constant dense<0.000000e+00> : vector<8x128xf32>
    %10 = tpu.matmul %8, %9, %cst_8 {dimension_numbers = #tpu.dot_dimension_numbers<[1], [0], [0], [1], [0, 0, 1, 1], [], []>} : vector<8x128xbf16>, vector<128x128xbf16>, vector<8x128xf32> -> vector<8x128xf32>
    %c0_9 = arith.constant 0 : index
    %c0_10 = arith.constant 0 : index
    %11 = vector.load %arg5[%c0_9, %c0_10] : memref<1x128xf32, #tpu.memory_space<vmem>>, vector<1x128xf32>
    %12 = vector.broadcast %11 : vector<1x128xf32> to vector<8x128xf32>
    %13 = arith.addf %10, %12 : vector<8x128xf32>
    %cst_11 = arith.constant 0.000000e+00 : f32
    %14 = vector.broadcast %cst_11 : f32 to vector<8x128xf32>
    %15 = arith.maximumf %13, %14 : vector<8x128xf32>
    %c0_12 = arith.constant 0 : index
    %c0_13 = arith.constant 0 : index
    %16 = vector.load %arg6[%c0_12, %c0_13] : memref<8x128xf32, #tpu.memory_space<vmem>>, vector<8x128xf32>
    tpu.vector_store %arg6[%c0_12, %c0_13], %15 {strides = array<i32>} : memref<8x128xf32, #tpu.memory_space<vmem>>, vector<8x128xf32>,
    return
  }
  func.func @transform_0(%arg0: i32) -> (i32, i32) {
    %c0_i32 = arith.constant 0 : i32
    %c0_i32_0 = arith.constant 0 : i32
    return %arg0, %c0_i32 : i32, i32
  }
  func.func @transform_1(%arg0: i32) -> (i32, i32) {
    %c0_i32 = arith.constant 0 : i32
    %c0_i32_0 = arith.constant 0 : i32
    %c0_i32_1 = arith.constant 0 : i32
    return %c0_i32, %c0_i32_0 : i32, i32
  }
  func.func @transform_2(%arg0: i32) -> (i32, i32) {
    %c0_i32 = arith.constant 0 : i32
    %c0_i32_0 = arith.constant 0 : i32
    %c0_i32_1 = arith.constant 0 : i32
    return %c0_i32, %c0_i32_0 : i32, i32
  }
  func.func @transform_3(%arg0: i32) -> (i32, i32) {
    %c0_i32 = arith.constant 0 : i32
    %c0_i32_0 = arith.constant 0 : i32
    %c0_i32_1 = arith.constant 0 : i32
    return %c0_i32, %c0_i32_0 : i32, i32
  }
  func.func @transform_4(%arg0: i32) -> (i32, i32) {
    %c0_i32 = arith.constant 0 : i32
    %c0_i32_0 = arith.constant 0 : i32
    %c0_i32_1 = arith.constant 0 : i32
    return %c0_i32, %c0_i32_0 : i32, i32
  }
  func.func @transform_5(%arg0: i32) -> (i32, i32) {
    %c0_i32 = arith.constant 0 : i32
    %c0_i32_0 = arith.constant 0 : i32
    return %arg0, %c0_i32 : i32, i32
  }
}

</mosaic_0001>

<bundles_post_ra>
// kernel: tpu_custom_call.1
= control target key start
LH: loop header
LB: loop body
LE: loop exit
PB: predicated region body
PF: predicated region fallthrough
CT: control target
= control target key end

     0   :  { %10 = vsyncpa [#allocation3], 0  ;;  %s596_s0 = inlined_call_operand.hbm [shape: bf16[8,128], index: 0, kind: input, shape index: {}]   ;;  %s597_s1 = inlined_call_operand.hbm [shape: bf16[128,128], index: 1, kind: input, shape index: {}]   ;;  %s598_s2 = inlined_call_operand.vmem [shape: f32[1,128], index: 2, kind: input, shape index: {}]   ;;  %s599_s3 = inlined_call_operand.hbm [shape: bf16[128,128], index: 3, kind: input, shape index: {}]   ;;  %s600_s4 = inlined_call_operand.vmem [shape: f32[1,128], index: 4, kind: input, shape index: {}]   ;;  %s601_s5 = inlined_call_operand.hbm [shape: f32[8,128], index: 5, kind: output, shape index: {}]  }
   0x1   :  { %11 = vsyncpa [#allocation6], 0 }
   0x2   :  { %12 = vsyncpa [#allocation4], 0  ;;  %s498_s18 = smov [#allocation5]   ;;  %s404_s22 = scalar_lea.hbm %s597_s1, 1024 }
   0x3   :  { %s28_s19 = sshll.u32 %s498_s18, 4  ;;  %p405_p0 = scmp.ne.s32.totalorder %s597_s1, %s404_s22  ;;  %s29_s19 = int_to_ptr.vmem [resolvable:$true] %s28_s19 }
   0x4   :  { %p408_p1 = scmp.lt.u32.totalorder %s404_s22, %s597_s1 }
   0x6   :  { %p410_p2 = pnand %p408_p1, %p405_p0 }
   0x8   :  { %413 = shalt.err (!%p410_p2)
}
   0x9   :  { %s414_s27 = scalar_lea.vmem %s29_s19, 1024  ;;  %p419_p4 = scmp.lt.s32.totalorder %s29_s19, %s29_s19 }
   0xa   :  { %p415_p3 = scmp.ne.s32.totalorder %s29_s19, %s414_s27  ;;  %p420_p5 = scmp.lt.s32.totalorder %s414_s27, %s414_s27 }
   0xc   :  { %p421_p6 = por %p420_p5, %p419_p4 }
   0xe   :  { %p422_p7 = pnand %p421_p6, %p415_p3 }
  0x10   :  { %425 = shalt.err (!%p422_p7)
}
  0x11   :  { %s499_s28 = smov 64   ;;  %s500_s29 = smov 4  }
  0x12   :  { %34 = dma.hbm_to_vmem [thread:$0]  %s597_s1, 1024, %s29_s19, [#allocation6], %s499_s28, %s499_s28, %s500_s29  }
  0x13   :  { %s501_s7 = smov [#allocation2]   ;;  %s502_s9 = smov [#allocation7]  }
  0x14   :  { %s19_s8 = sshll.u32 %s501_s7, 4  ;;  %s42_s10 = sshll.u32 %s502_s9, 4  ;;  %s20_s8 = int_to_ptr.vmem [resolvable:$true] %s19_s8  ;;  %s43_s10 = int_to_ptr.vmem [resolvable:$true] %s42_s10 }
  0x15   :  { %s426_s13 = scalar_lea.hbm %s596_s0, 64 }
  0x16   :  { %p427_p8 = scmp.ne.s32.totalorder %s596_s0, %s426_s13  ;;  %p430_p9 = scmp.lt.u32.totalorder %s426_s13, %s596_s0 }
  0x18   :  { %p432_p10 = pnand %p430_p9, %p427_p8 }
  0x1a   :  { %435 = shalt.err (!%p432_p10)
}
  0x1b   :  { %s436_s1 = scalar_lea.vmem %s20_s8, 64  ;;  %p441_p12 = scmp.lt.s32.totalorder %s20_s8, %s20_s8 }
  0x1c   :  { %p437_p11 = scmp.ne.s32.totalorder %s20_s8, %s436_s1  ;;  %p442_p13 = scmp.lt.s32.totalorder %s436_s1, %s436_s1 }
  0x1e   :  { %p443_p0 = por %p442_p13, %p441_p12 }
  0x20   :  { %p444_p1 = pnand %p443_p0, %p437_p11 }
  0x22   :  { %447 = shalt.err (!%p444_p1)
}
  0x23   :  { %22 = dma.hbm_to_vmem [thread:$0]  %s596_s0, 64, %s20_s8, [#allocation3]  }
  0x24   :  { %s448_s22 = scalar_lea.hbm %s599_s3, 1024 }
  0x25   :  { %p449_p2 = scmp.ne.s32.totalorder %s599_s3, %s448_s22  ;;  %p452_p3 = scmp.lt.u32.totalorder %s448_s22, %s599_s3 }
  0x27   :  { %p454_p4 = pnand %p452_p3, %p449_p2 }
  0x29   :  { %457 = shalt.err (!%p454_p4)
}
  0x2a   :  { %s458_s27 = scalar_lea.vmem %s43_s10, 1024  ;;  %p463_p6 = scmp.lt.s32.totalorder %s43_s10, %s43_s10 }
  0x2b   :  { %p459_p5 = scmp.ne.s32.totalorder %s43_s10, %s458_s27  ;;  %p464_p7 = scmp.lt.s32.totalorder %s458_s27, %s458_s27 }
  0x2d   :  { %p465_p8 = por %p464_p7, %p463_p6 }
  0x2f   :  { %p466_p9 = pnand %p465_p8, %p459_p5 }
  0x31   :  { %469 = shalt.err (!%p466_p9)
}
  0x32   :  { %48 = dma.hbm_to_vmem [thread:$0]  %s599_s3, 1024, %s43_s10, [#allocation6], %s499_s28, %s499_s28, %s500_s29  }
  0x33   :  { %492 = dma.done.wait [#allocation3], 64  }
  0x34   :  { %493 = vsyncadd [#allocation3], 4294967232 }
  0x35   :  { %494 = dma.done.wait [#allocation6], 2048  }
  0x36   :  { %495 = vsyncadd [#allocation6], 4294965248  ;;  %v503_v0 = vmov 0.0   ;;  %vm504_vm0 = vmmov 0   ;;  %v388_v1 = vld [vmem:[#allocation5] sm:$0xff]   ;;  %v389_v2 = vld [vmem:[#allocation5 + $0x8] sm:$0xff]  }
  0x37   :  { %340 = vmatprep.subr.bf16.mxu0 %v503_v0  ;;  %356 = vmatprep.mubr.msk.bf16.mxu0 %vm504_vm0, %v503_v0  ;;  %v390_v3 = vld [vmem:[#allocation5 + $0x10] sm:$0xff]   ;;  %v396_v4 = vld [vmem:[#allocation7] sm:$0xff]   ;;  %v391_v5 = vld [vmem:[#allocation5 + $0x18] sm:$0xff]   ;;  %s505_s7 = smov [#allocation8]  }
  0x38   :  { %360 = vmatprep.subr.bf16.mxu1 %v503_v0  ;;  %376 = vmatprep.mubr.msk.bf16.mxu1 %vm504_vm0, %v503_v0  ;;  %v397_v6 = vld [vmem:[#allocation7 + $0x8] sm:$0xff]   ;;  %v392_v7 = vld [vmem:[#allocation5 + $0x20] sm:$0xff]   ;;  %v398_v8 = vld [vmem:[#allocation7 + $0x10] sm:$0xff]   ;;  %s294_s8 = sshll.u32 %s505_s7, 4  ;;  %s295_s8 = int_to_ptr.vmem [resolvable:$true] %s294_s8 }
  0x39   :  { %341 = vmatpush3.bf16.msra.mxu0 %v388_v1  ;;  %361 = vmatpush3.bf16.msra.mxu1 %v396_v4  ;;  %v393_v9 = vld [vmem:[#allocation5 + $0x28] sm:$0xff]   ;;  %v399_v10 = vld [vmem:[#allocation7 + $0x18] sm:$0xff]   ;;  %v394_v11 = vld [vmem:[#allocation5 + $0x30] sm:$0xff]   ;;  %p475_p11 = scmp.lt.s32.totalorder %s295_s8, %s295_s8 }
  0x3a   :  { %342 = vmatprep.subr.bf16.mxu0 %v503_v0  ;;  %362 = vmatprep.subr.bf16.mxu1 %v503_v0  ;;  %v400_v12 = vld [vmem:[#allocation7 + $0x20] sm:$0xff]   ;;  %v395_v13 = vld [vmem:[#allocation5 + $0x38] sm:$0xff]   ;;  %v401_v14 = vld [vmem:[#allocation7 + $0x28] sm:$0xff]  }
  0x3b   :  { %v61_v15 = vld [vmem:[#allocation2] sm:$0xf]  ;;  %v402_v16 = vld [vmem:[#allocation7 + $0x30] sm:$0xff]  }
  0x3c   :  { %v403_v17 = vld [vmem:[#allocation7 + $0x38] sm:$0xff]  }
  0x3d   :  { %343 = vmatpush3.bf16.msra.mxu0 %v389_v2  ;;  %363 = vmatpush3.bf16.msra.mxu1 %v397_v6  ;;  %v304_v18 = vld [vmem:[%s598_s2] ss:$0 sm:$0xff]  ;;  %s470_s2 = scalar_lea.vmem %s295_s8, 128 }
  0x3e   :  { %344 = vmatprep.subr.bf16.mxu0 %v503_v0  ;;  %364 = vmatprep.subr.bf16.mxu1 %v503_v0  ;;  %v313_v26 = vld [vmem:[%s600_s4] ss:$0 sm:$0xff]  ;;  %p471_p10 = scmp.ne.s32.totalorder %s295_s8, %s470_s2  ;;  %p476_p12 = scmp.lt.s32.totalorder %s470_s2, %s470_s2 }
  0x40   :  { %p477_p13 = por %p476_p12, %p475_p11 }
  0x41   :  { %345 = vmatpush3.bf16.msra.mxu0 %v390_v3  ;;  %365 = vmatpush3.bf16.msra.mxu1 %v398_v8 }
  0x42   :  { %346 = vmatprep.subr.bf16.mxu0 %v503_v0  ;;  %366 = vmatprep.subr.bf16.mxu1 %v503_v0  ;;  %p478_p0 = pnand %p477_p13, %p471_p10 }
  0x45   :  { %347 = vmatpush3.bf16.msra.mxu0 %v391_v5  ;;  %367 = vmatpush3.bf16.msra.mxu1 %v399_v10 }
  0x46   :  { %348 = vmatprep.subr.bf16.mxu0 %v503_v0  ;;  %368 = vmatprep.subr.bf16.mxu1 %v503_v0 }
  0x49   :  { %349 = vmatpush3.bf16.msra.mxu0 %v392_v7  ;;  %369 = vmatpush3.bf16.msra.mxu1 %v400_v12 }
  0x4a   :  { %350 = vmatprep.subr.bf16.mxu0 %v503_v0  ;;  %370 = vmatprep.subr.bf16.mxu1 %v503_v0 }
  0x4d   :  { %351 = vmatpush3.bf16.msra.mxu0 %v393_v9  ;;  %371 = vmatpush3.bf16.msra.mxu1 %v401_v14 }
  0x4e   :  { %352 = vmatprep.subr.bf16.mxu0 %v503_v0  ;;  %372 = vmatprep.subr.bf16.mxu1 %v503_v0 }
  0x51   :  { %353 = vmatpush3.bf16.msra.mxu0 %v394_v11  ;;  %373 = vmatpush3.bf16.msra.mxu1 %v402_v16 }
  0x52   :  { %354 = vmatprep.subr.bf16.mxu0 %v503_v0  ;;  %374 = vmatprep.subr.bf16.mxu1 %v503_v0 }
  0x55   :  { %355 = vmatpush3.bf16.msra.mxu0 %v395_v13  ;;  %375 = vmatpush3.bf16.msra.mxu1 %v403_v17 }
  0x58   :  { %357 = vmatmul.mubr.bf16.vlgmr.msra.gmra.mrb[0].mxu0 %v61_v15 }
 0x12b   :  { %v167_v19 = vpop.f32.mrb[0].mxu0 }
 0x12c   :  { %v168_v20 = vadd.f32 %v304_v18, %v167_v19  ;;  %v358_v21 = vpop.f32.mrb[1].mxu0 }
 0x12d   :  { %v170_v22 = vpop.f32.mrb[2].mxu0 }
 0x12e   :  { %v173_v23 = vmax.f32 %v168_v20, 0.0  ;;  %v359_v24 = vpop.f32.mrb[3].mxu0 }
 0x130   :  { %v174_v25 = vpack.c.bf16 %v173_v23, %v173_v23 }
 0x132   :  { %377 = vmatmul.mubr.bf16.vlgmr.msra.gmra.mrb[0].mxu1 %v174_v25 }
 0x205   :  { %v280_v27 = vpop.f32.mrb[0].mxu1 }
 0x206   :  { %v281_v28 = vadd.f32 %v313_v26, %v280_v27  ;;  %v378_v29 = vpop.f32.mrb[1].mxu1 }
 0x207   :  { %v283_v30 = vpop.f32.mrb[2].mxu1 }
 0x208   :  { %v286_v31 = vmax.f32 %v281_v28, 0.0  ;;  %v379_v32 = vpop.f32.mrb[3].mxu1 }
 0x20a   :  { %287 = vst [vmem:[#allocation8] sm:$0xff] %v286_v31 }
 0x20b   :  { %481 = shalt.err (!%p478_p0)
}
 0x20c   :  { %s482_s4 = scalar_lea.hbm %s601_s5, 128 }
 0x20d   :  { %p483_p1 = scmp.ne.s32.totalorder %s601_s5, %s482_s4  ;;  %p486_p2 = scmp.lt.u32.totalorder %s482_s4, %s601_s5 }
 0x20f   :  { %p488_p3 = pnand %p486_p2, %p483_p1 }
 0x211   :  { %491 = shalt.err (!%p488_p3)
}
 0x212   :  { %297 = dma.vmem_to_hbm [thread:$0]  %s295_s8, 128, %s601_s5, [#allocation4]  }
 0x213   :  { %496 = dma.done.wait [#allocation4], 128  }
 0x214   :  { %497 = vsyncadd [#allocation4], 4294967168 }
 0x215   :  { %301 = vsyncpa [#allocation3], 1 }
 0x216   :  { %302 = vsyncpa [#allocation6], 1 }
 0x217   :  { %303 = vsyncpa [#allocation4], 1 }

</bundles_post_ra>
